<compile_context>
chip_gen: v7x
topology: tpu7x:2x2x1
jax: 0.10.0
libtpu: 0.0.40
codegen_flags: <defaults>
</compile_context>

<pallas_src>
import functools

import jax
import jax.numpy as jnp
from jax import lax
from jax.experimental import pallas as pl
from jax.experimental.pallas import tpu as pltpu

PAD = 4  # max halo: diagonal 5x5 conv, dilation=2 -> pad 4 (also covers pad 3)


def _directional_kernel(n_h_tiles, xp_ref, oh_ref, ov_ref, od_ref):
    """xp_ref : (H+8, W+8) reflect-padded image of one batch item (VMEM).
    oh/ov/od_ref : (TH, W) output row-tiles for this grid step (VMEM)."""
    TH, W = oh_ref.shape
    # First output row of this tile.  Static 0 when H is not tiled (fast path
    # for small images); dynamic sublane offset otherwise.
    row0 = 0 if n_h_tiles == 1 else pl.program_id(1) * TH

    def win(r_off, c_off):
        # (TH, W) window of the padded image at (row0 + r_off, c_off).
        # Row (sublane) shifts are slices; column (lane) shifts are static
        # slices handled by the compiler's lane-shift path.
        return xp_ref[pl.ds(row0 + r_off, TH), c_off:c_off + W]

    # Horizontal conv: kernel (1,7) = [-1,-1,0,1,1,1,0], padding (0,3).
    # Output row r lives at padded row r+4; tap k sits at padded col c+1+k.
    oh_ref[...] = (-win(4, 1) - win(4, 2)
                   + win(4, 4) + win(4, 5) + win(4, 6))

    # Vertical conv: kernel (7,1) = [-1,-1,0,1,1,1,0]^T, padding (3,0).
    # Tap k sits at padded row r+1+k; columns at padded col c+4.
    ov_ref[...] = (-win(1, 4) - win(2, 4)
                   + win(4, 4) + win(5, 4) + win(6, 4))

    # Diagonal conv: 5x5 kernel, dilation 2, padding 4 -> tap (i,j) at padded
    # offset (2i, 2j); only the 8 nonzero +-1 taps are kept.
    od_ref[...] = (win(0, 0) - win(0, 8)
                   + win(2, 2) - win(2, 6)
                   - win(6, 2) + win(6, 6)
                   - win(8, 0) + win(8, 8))


def _pick_row_tile(H, target=256):
    """Largest divisor of H that is a multiple of 8 and <= target (keeps the
    output blocks sublane-aligned and VMEM-friendly on v5e/v6e/v7x); falls
    back to the full height for small or awkward H."""
    if H <= target:
        return H
    for t in range(target, 7, -1):
        if H % t == 0 and t % 8 == 0:
            return t
    return H


@jax.jit
def directional_conv_model(x):
    """Forward pass of DirectionalConvModel (dim=1).

    x: (N, 1, H, W) float32 -> (horizontal, vertical, diagonal), each
    (N, 1, H, W) float32, identical to the PyTorch module with the fixed
    _init_directional_weights weights and zero bias."""
    N, C, H, W = x.shape
    assert C == 1, "module was built with dim=1"
    x3 = x[:, 0].astype(jnp.float32)

    # One maximal reflect pad (PyTorch padding_mode='reflect' == jnp 'reflect').
    # Requires H, W >= 5 (same constraint the original diagonal conv imposes).
    xp = jnp.pad(x3, ((0, 0), (PAD, PAD), (PAD, PAD)), mode="reflect")
    Hp, Wp = H + 2 * PAD, W + 2 * PAD

    TH = _pick_row_tile(H)
    n_h = H // TH

    out_sds = [jax.ShapeDtypeStruct((N, H, W), jnp.float32)] * 3
    oh, ov, od = pl.pallas_call(
        functools.partial(_directional_kernel, n_h),
        out_shape=out_sds,
        grid=(N, n_h),
        in_specs=[
            # Full padded image of the current batch item.  The block index is
            # identical for every h-step, so it is copied HBM->VMEM once per
            # image and reused by all three convolutions.
            pl.BlockSpec((None, Hp, Wp), lambda n, h: (n, 0, 0)),
        ],
        out_specs=[
            pl.BlockSpec((None, TH, W), lambda n, h: (n, h, 0)),
        ] * 3,
        compiler_params=pltpu.CompilerParams(
            dimension_semantics=("parallel", "parallel")),
    )(xp)

    # Restore NCHW (C=1).
    return oh[:, None], ov[:, None], od[:, None]


# ----------------------------------------------------------------------------
# Independent pure-JAX reference (uses the actual conv weights, not the baked
# constants) to validate the kernel.
# ----------------------------------------------------------------------------
def _make_weights():
    h_kernel = jnp.array([-1, -1, 0, 1, 1, 1, 0], dtype=jnp.float32)
    v_kernel = jnp.array([-1, -1, 0, 1, 1, 1, 0], dtype=jnp.float32)
    d_kernel = jnp.array([[1, 0, 0, 0, -1],
                          [0, 1, 0, -1, 0],
                          [0, 0, 0, 0, 0],
                          [0, -1, 0, 1, 0],
                          [-1, 0, 0, 0, 1]], dtype=jnp.float32)
    return h_kernel, v_kernel, d_kernel


def _reference(x):
    hw, vw, dw = _make_weights()
    dn = lax.conv_dimension_numbers(x.shape, (1, 1, 1, 7), ("NCHW", "OIHW", "NCHW"))

    xh = jnp.pad(x, ((0, 0), (0, 0), (0, 0), (3, 3)), mode="reflect")
    oh = lax.conv_general_dilated(xh, hw.reshape(1, 1, 1, 7), (1, 1), "VALID",
                                  dimension_numbers=dn)
    xv = jnp.pad(x, ((0, 0), (0, 0), (3, 3), (0, 0)), mode="reflect")
    ov = lax.conv_general_dilated(xv, vw.reshape(1, 1, 7, 1), (1, 1), "VALID",
                                  dimension_numbers=dn)
    xd = jnp.pad(x, ((0, 0), (0, 0), (4, 4), (4, 4)), mode="reflect")
    od = lax.conv_general_dilated(xd, dw.reshape(1, 1, 5, 5), (1, 1), "VALID",
                                  rhs_dilation=(2, 2), dimension_numbers=dn)
    return oh, ov, od


if __name__ == "__main__":
    key = jax.random.PRNGKey(0)
    # Module was built with dim=1 channels; small spatial size.
    x = jax.random.normal(key, (2, 1, 16, 16), dtype=jnp.float32)

    outs = directional_conv_model(x)
    outs = jax.block_until_ready(outs)

    refs = _reference(x)
    for o, r in zip(outs, refs):
        assert o.shape == r.shape
        assert jnp.allclose(o, r, atol=1e-5, rtol=1e-5)

    print("KERNEL_OK")
</pallas_src>

<mosaic_0001>
module attributes {stable_mosaic.version = 11 : i64} {
  func.func @_directional_kernel(%arg0: i32, %arg1: i32, %arg2: memref<1x24x24xf32, #tpu.memory_space<vmem>>, %arg3: memref<1x16x16xf32, #tpu.memory_space<vmem>>, %arg4: memref<1x16x16xf32, #tpu.memory_space<vmem>>, %arg5: memref<1x16x16xf32, #tpu.memory_space<vmem>>) attributes {dimension_semantics = [#tpu.dimension_semantics<parallel>, #tpu.dimension_semantics<parallel>], iteration_bounds = array<i64: 2, 1>, scalar_prefetch = 0 : i64, scratch_operands = 0 : i64, tpu.core_type = #tpu.core_type<tc>, window_params = [{transform_indices = @transform_0, window_bounds = array<i64: 1, 24, 24>}, {transform_indices = @transform_1, window_bounds = array<i64: 1, 16, 16>}, {transform_indices = @transform_2, window_bounds = array<i64: 1, 16, 16>}, {transform_indices = @transform_3, window_bounds = array<i64: 1, 16, 16>}]} {
    %c0 = arith.constant 0 : index
    %c4 = arith.constant 4 : index
    %c1 = arith.constant 1 : index
    %0 = vector.load %arg2[%c0, %c4, %c1] : memref<1x24x24xf32, #tpu.memory_space<vmem>>, vector<1x16x16xf32>
    %1 = vector.shape_cast %0 : vector<1x16x16xf32> to vector<16x16xf32>
    %cst = arith.constant 0.000000e+00 : f32
    %2 = vector.broadcast %cst : f32 to vector<16x16xf32>
    %3 = arith.subf %2, %1 : vector<16x16xf32>
    %c0_0 = arith.constant 0 : index
    %c4_1 = arith.constant 4 : index
    %c2 = arith.constant 2 : index
    %4 = vector.load %arg2[%c0_0, %c4_1, %c2] : memref<1x24x24xf32, #tpu.memory_space<vmem>>, vector<1x16x16xf32>
    %5 = vector.shape_cast %4 : vector<1x16x16xf32> to vector<16x16xf32>
    %6 = arith.subf %3, %5 : vector<16x16xf32>
    %c0_2 = arith.constant 0 : index
    %c4_3 = arith.constant 4 : index
    %c4_4 = arith.constant 4 : index
    %7 = vector.load %arg2[%c0_2, %c4_3, %c4_4] : memref<1x24x24xf32, #tpu.memory_space<vmem>>, vector<1x16x16xf32>
    %8 = vector.shape_cast %7 : vector<1x16x16xf32> to vector<16x16xf32>
    %9 = arith.addf %6, %8 : vector<16x16xf32>
    %c0_5 = arith.constant 0 : index
    %c4_6 = arith.constant 4 : index
    %c5 = arith.constant 5 : index
    %10 = vector.load %arg2[%c0_5, %c4_6, %c5] : memref<1x24x24xf32, #tpu.memory_space<vmem>>, vector<1x16x16xf32>
    %11 = vector.shape_cast %10 : vector<1x16x16xf32> to vector<16x16xf32>
    %12 = arith.addf %9, %11 : vector<16x16xf32>
    %c0_7 = arith.constant 0 : index
    %c4_8 = arith.constant 4 : index
    %c6 = arith.constant 6 : index
    %13 = vector.load %arg2[%c0_7, %c4_8, %c6] : memref<1x24x24xf32, #tpu.memory_space<vmem>>, vector<1x16x16xf32>
    %14 = vector.shape_cast %13 : vector<1x16x16xf32> to vector<16x16xf32>
    %15 = arith.addf %12, %14 : vector<16x16xf32>
    %c0_9 = arith.constant 0 : index
    %c0_10 = arith.constant 0 : index
    %c0_11 = arith.constant 0 : index
    %16 = vector.load %arg3[%c0_9, %c0_10, %c0_11] : memref<1x16x16xf32, #tpu.memory_space<vmem>>, vector<1x16x16xf32>
    %17 = vector.shape_cast %16 : vector<1x16x16xf32> to vector<16x16xf32>
    %18 = vector.shape_cast %15 : vector<16x16xf32> to vector<1x16x16xf32>
    tpu.vector_store %arg3[%c0_9, %c0_10, %c0_11], %18 {strides = array<i32>} : memref<1x16x16xf32, #tpu.memory_space<vmem>>, vector<1x16x16xf32>,
    %c0_12 = arith.constant 0 : index
    %c1_13 = arith.constant 1 : index
    %c4_14 = arith.constant 4 : index
    %19 = vector.load %arg2[%c0_12, %c1_13, %c4_14] : memref<1x24x24xf32, #tpu.memory_space<vmem>>, vector<1x16x16xf32>
    %20 = vector.shape_cast %19 : vector<1x16x16xf32> to vector<16x16xf32>
    %cst_15 = arith.constant 0.000000e+00 : f32
    %21 = vector.broadcast %cst_15 : f32 to vector<16x16xf32>
    %22 = arith.subf %21, %20 : vector<16x16xf32>
    %c0_16 = arith.constant 0 : index
    %c2_17 = arith.constant 2 : index
    %c4_18 = arith.constant 4 : index
    %23 = vector.load %arg2[%c0_16, %c2_17, %c4_18] : memref<1x24x24xf32, #tpu.memory_space<vmem>>, vector<1x16x16xf32>
    %24 = vector.shape_cast %23 : vector<1x16x16xf32> to vector<16x16xf32>
    %25 = arith.subf %22, %24 : vector<16x16xf32>
    %c0_19 = arith.constant 0 : index
    %c4_20 = arith.constant 4 : index
    %c4_21 = arith.constant 4 : index
    %26 = vector.load %arg2[%c0_19, %c4_20, %c4_21] : memref<1x24x24xf32, #tpu.memory_space<vmem>>, vector<1x16x16xf32>
    %27 = vector.shape_cast %26 : vector<1x16x16xf32> to vector<16x16xf32>
    %28 = arith.addf %25, %27 : vector<16x16xf32>
    %c0_22 = arith.constant 0 : index
    %c5_23 = arith.constant 5 : index
    %c4_24 = arith.constant 4 : index
    %29 = vector.load %arg2[%c0_22, %c5_23, %c4_24] : memref<1x24x24xf32, #tpu.memory_space<vmem>>, vector<1x16x16xf32>
    %30 = vector.shape_cast %29 : vector<1x16x16xf32> to vector<16x16xf32>
    %31 = arith.addf %28, %30 : vector<16x16xf32>
    %c0_25 = arith.constant 0 : index
    %c6_26 = arith.constant 6 : index
    %c4_27 = arith.constant 4 : index
    %32 = vector.load %arg2[%c0_25, %c6_26, %c4_27] : memref<1x24x24xf32, #tpu.memory_space<vmem>>, vector<1x16x16xf32>
    %33 = vector.shape_cast %32 : vector<1x16x16xf32> to vector<16x16xf32>
    %34 = arith.addf %31, %33 : vector<16x16xf32>
    %c0_28 = arith.constant 0 : index
    %c0_29 = arith.constant 0 : index
    %c0_30 = arith.constant 0 : index
    %35 = vector.load %arg4[%c0_28, %c0_29, %c0_30] : memref<1x16x16xf32, #tpu.memory_space<vmem>>, vector<1x16x16xf32>
    %36 = vector.shape_cast %35 : vector<1x16x16xf32> to vector<16x16xf32>
    %37 = vector.shape_cast %34 : vector<16x16xf32> to vector<1x16x16xf32>
    tpu.vector_store %arg4[%c0_28, %c0_29, %c0_30], %37 {strides = array<i32>} : memref<1x16x16xf32, #tpu.memory_space<vmem>>, vector<1x16x16xf32>,
    %c0_31 = arith.constant 0 : index
    %c0_32 = arith.constant 0 : index
    %c0_33 = arith.constant 0 : index
    %38 = vector.load %arg2[%c0_31, %c0_32, %c0_33] : memref<1x24x24xf32, #tpu.memory_space<vmem>>, vector<1x16x16xf32>
    %39 = vector.shape_cast %38 : vector<1x16x16xf32> to vector<16x16xf32>
    %c0_34 = arith.constant 0 : index
    %c0_35 = arith.constant 0 : index
    %c8 = arith.constant 8 : index
    %40 = vector.load %arg2[%c0_34, %c0_35, %c8] : memref<1x24x24xf32, #tpu.memory_space<vmem>>, vector<1x16x16xf32>
    %41 = vector.shape_cast %40 : vector<1x16x16xf32> to vector<16x16xf32>
    %42 = arith.subf %39, %41 : vector<16x16xf32>
    %c0_36 = arith.constant 0 : index
    %c2_37 = arith.constant 2 : index
    %c2_38 = arith.constant 2 : index
    %43 = vector.load %arg2[%c0_36, %c2_37, %c2_38] : memref<1x24x24xf32, #tpu.memory_space<vmem>>, vector<1x16x16xf32>
    %44 = vector.shape_cast %43 : vector<1x16x16xf32> to vector<16x16xf32>
    %45 = arith.addf %42, %44 : vector<16x16xf32>
    %c0_39 = arith.constant 0 : index
    %c2_40 = arith.constant 2 : index
    %c6_41 = arith.constant 6 : index
    %46 = vector.load %arg2[%c0_39, %c2_40, %c6_41] : memref<1x24x24xf32, #tpu.memory_space<vmem>>, vector<1x16x16xf32>
    %47 = vector.shape_cast %46 : vector<1x16x16xf32> to vector<16x16xf32>
    %48 = arith.subf %45, %47 : vector<16x16xf32>
    %c0_42 = arith.constant 0 : index
    %c6_43 = arith.constant 6 : index
    %c2_44 = arith.constant 2 : index
    %49 = vector.load %arg2[%c0_42, %c6_43, %c2_44] : memref<1x24x24xf32, #tpu.memory_space<vmem>>, vector<1x16x16xf32>
    %50 = vector.shape_cast %49 : vector<1x16x16xf32> to vector<16x16xf32>
    %51 = arith.subf %48, %50 : vector<16x16xf32>
    %c0_45 = arith.constant 0 : index
    %c6_46 = arith.constant 6 : index
    %c6_47 = arith.constant 6 : index
    %52 = vector.load %arg2[%c0_45, %c6_46, %c6_47] : memref<1x24x24xf32, #tpu.memory_space<vmem>>, vector<1x16x16xf32>
    %53 = vector.shape_cast %52 : vector<1x16x16xf32> to vector<16x16xf32>
    %54 = arith.addf %51, %53 : vector<16x16xf32>
    %c0_48 = arith.constant 0 : index
    %c8_49 = arith.constant 8 : index
    %c0_50 = arith.constant 0 : index
    %55 = vector.load %arg2[%c0_48, %c8_49, %c0_50] : memref<1x24x24xf32, #tpu.memory_space<vmem>>, vector<1x16x16xf32>
    %56 = vector.shape_cast %55 : vector<1x16x16xf32> to vector<16x16xf32>
    %57 = arith.subf %54, %56 : vector<16x16xf32>
    %c0_51 = arith.constant 0 : index
    %c8_52 = arith.constant 8 : index
    %c8_53 = arith.constant 8 : index
    %58 = vector.load %arg2[%c0_51, %c8_52, %c8_53] : memref<1x24x24xf32, #tpu.memory_space<vmem>>, vector<1x16x16xf32>
    %59 = vector.shape_cast %58 : vector<1x16x16xf32> to vector<16x16xf32>
    %60 = arith.addf %57, %59 : vector<16x16xf32>
    %c0_54 = arith.constant 0 : index
    %c0_55 = arith.constant 0 : index
    %c0_56 = arith.constant 0 : index
    %61 = vector.load %arg5[%c0_54, %c0_55, %c0_56] : memref<1x16x16xf32, #tpu.memory_space<vmem>>, vector<1x16x16xf32>
    %62 = vector.shape_cast %61 : vector<1x16x16xf32> to vector<16x16xf32>
    %63 = vector.shape_cast %60 : vector<16x16xf32> to vector<1x16x16xf32>
    tpu.vector_store %arg5[%c0_54, %c0_55, %c0_56], %63 {strides = array<i32>} : memref<1x16x16xf32, #tpu.memory_space<vmem>>, vector<1x16x16xf32>,
    return
  }
  func.func @transform_0(%arg0: i32, %arg1: i32) -> (i32, i32, i32) {
    %c0_i32 = arith.constant 0 : i32
    %c0_i32_0 = arith.constant 0 : i32
    %c0_i32_1 = arith.constant 0 : i32
    return %arg0, %c0_i32, %c0_i32_0 : i32, i32, i32
  }
  func.func @transform_1(%arg0: i32, %arg1: i32) -> (i32, i32, i32) {
    %c0_i32 = arith.constant 0 : i32
    %c0_i32_0 = arith.constant 0 : i32
    return %arg0, %arg1, %c0_i32 : i32, i32, i32
  }
  func.func @transform_2(%arg0: i32, %arg1: i32) -> (i32, i32, i32) {
    %c0_i32 = arith.constant 0 : i32
    %c0_i32_0 = arith.constant 0 : i32
    return %arg0, %arg1, %c0_i32 : i32, i32, i32
  }
  func.func @transform_3(%arg0: i32, %arg1: i32) -> (i32, i32, i32) {
    %c0_i32 = arith.constant 0 : i32
    %c0_i32_0 = arith.constant 0 : i32
    return %arg0, %arg1, %c0_i32 : i32, i32, i32
  }
}

</mosaic_0001>

<bundles_post_ra>
// kernel: directional_conv_model.1
= control target key start
LH: loop header
LB: loop body
LE: loop exit
PB: predicated region body
PF: predicated region fallthrough
CT: control target
= control target key end

     0   :  { %9 = vsyncpa [#allocation3], 0  ;;  %s1072_s0 = inlined_call_operand.vmem [shape: f32[2,24,24], index: 0, kind: input, shape index: {}]   ;;  %s1073_s1 = inlined_call_operand.hbm [shape: f32[2,16,16], index: 1, kind: output, shape index: {0}]   ;;  %s1074_s2 = inlined_call_operand.hbm [shape: f32[2,16,16], index: 2, kind: output, shape index: {1}]   ;;  %s1075_s3 = inlined_call_operand.hbm [shape: f32[2,16,16], index: 3, kind: output, shape index: {2}]  }
   0x1   :  { %11 = vsyncpa [#allocation3 + $0x1], 0 }
   0x2   :  { %12 = vsyncpa [#allocation5], 0 }
   0x3   :  { %14 = vsyncpa [#allocation5 + $0x1], 0  ;;  %s822_s12 = smov 0   ;;  %s824_s13 = smov 0  }
   0x4   :  { %s826_s14 = smov 0   ;;  %s828_s15 = smov 0  }
   0x5   :  { %s830_s16 = smov 0   ;;  %s832_s17 = smov 0  }
   0x6 LB: > { %s552_s18 = sadd.s32 4294967295, %s788_s17   ;;  %s553_s19 = sadd.s32 4294967294, %s788_s17   ;;  %s788_s17 = sphi %s832_s17, %s20_s17   ;;  %s784_s16 = sphi %s830_s16, %s1082_s16   ;;  %s780_s15 = sphi %s828_s15, %s1081_s15   ;;  %s776_s14 = sphi %s826_s14, %s1080_s14   ;;  %s772_s13 = sphi %s824_s13, %s1079_s13   ;;  %s768_s12 = sphi %s822_s12, %s1078_s12  }
   0x7   : > { %s32_s20 = sadd.s32 1, %s784_s16  ;;  %s67_s21 = sadd.s32 1, %s776_s14 }
   0x8   : > { %p34_p0 = scmp.ge.s32.totalorder %s32_s20, 2  ;;  %p77_p1 = scmp.ne.s32.totalorder %s776_s14, %s772_s13 }
   0x9   : > { %p78_p2 = scmp.eq.s32.totalorder %s552_s18, 1  ;;  %p83_p3 = scmp.ne.s32.totalorder %s772_s13, %s768_s12 }
   0xa   : > { %s1084_s20 = smov (%p34_p0, %s32_s20), 0  ;;  %p84_p5 = scmp.eq.s32.totalorder %s553_s19, 1 }
   0xb   : > { %p864_p4 = por %p78_p2, %p77_p1  ;;  %s62_s23 = ssub.s32 %s784_s16, %s1084_s20 }
   0xc   : > { %p556_p6 = scmp.ge.s32.totalorder %s788_s17, 1  ;;  %p65_p7 = scmp.eq.s32.totalorder %s62_s23, 0 }
   0xd   : > { %p873_p8 = por %p84_p5, %p83_p3  ;;  %p166_p9 = scmp.lt.s32.totalorder %s788_s17, 3 }
   0xe   : > { %s879_s25 = scalar_select %p65_p7, %s776_s14, %s67_s21  }
   0xf   : > { %p167_p10 = pnand %p556_p6, %p166_p9 }
  0x10   : > { %p200_p11 = scmp.lt.s32.totalorder (!%p167_p10), %s780_s15, 1  ;;  %s790_s4 = smov (!%p167_p10), 125   ;;  %vm254_vm0 = vcmask (!%p167_p10), 130048  }
  0x11   : > { %170 = sbr.rel (%p167_p10) target bundleno = 288 (0x120), region = 24  ;;  %s791_s5 = smov (!%p167_p10), 127  }
  0x12   : > { %s792_s6 = smov (!%p167_p10), 124   ;;  %s793_s7 = smov (!%p167_p10), 123  }
  0x13   : > { %s794_s8 = smov (!%p167_p10), 120   ;;  %s795_s9 = smov (!%p167_p10), 126  }
  0x14   : > { %s796_s10 = smov (!%p167_p10), 122   ;;  %s183_s11 = sand.u32 (!%p167_p10), 1, %s772_s13  }
  0x15   : > { %s923_s21 = sshll.u32 (!%p167_p10), %s183_s11, 4  ;;  %s932_s28 = sshll.u32 (!%p167_p10), %s780_s15, 8 }
  0x16   : > { %s192_s23 = scalar_lea.vmem (!%p167_p10), [#allocation4], %s923_s21  ;;  %s199_s29 = scalar_lea.vmem (!%p167_p10), [#allocation6], %s923_s21 }
  0x18   : > { %s201_s26 = scalar_select %p200_p11, %s780_s15, 1 }
  0x1a   : > { %s575_s27 = smul.u32 24, %s201_s26  ;;  %s394_s26 = sshll.u32 %s192_s23, 4  ;;  %s936_s26 = int_to_ptr.vmem [resolvable:$true] %s394_s26 }
  0x1c   : > { %s886_s30 = scalar_lea.vmem %s1072_s0, %s575_s27  ;;  %s929_s27 = sand.u32 1, %s552_s18  }
  0x1d   : > { %v208_v0 = vld [vmem:[%s886_s30 + $0x4] sm:$0xff]  ;;  %v209_v1 = vld [vmem:[%s886_s30 + $0xc] sm:$0xff] }
  0x1e   : > { %222 = vrot.lane.b32.xlu1 %v208_v0, %s790_s4  ;;  %214 = vrot.lane.b32.xlu0 %v208_v0, %s791_s5  ;;  %v895_v2 = vld [vmem:[%s886_s30] sm:$0xff]  ;;  %v898_v3 = vld [vmem:[%s886_s30 + $0x8] sm:$0xff]  ;;  %v210_v25 = vsub.f32 0.0, %v208_v0  ;;  %v211_v26 = vsub.f32 0.0, %v209_v1 }
  0x1f   : > { %v257_v4 = vld [vmem:[%s886_s30 + $0x1] sm:$0xff]  ;;  %v300_v7 = vld [vmem:[%s886_s30 + $0xa] sm:$0xff] }
  0x20   : > { %v259_v5 = vsub.f32 0.0, %v257_v4  ;;  %v299_v6 = vld [vmem:[%s886_s30 + $0x2] sm:$0xff]  ;;  %v320_v14 = vld [vmem:[%s886_s30 + $0xe] sm:$0xff] }
  0x21   : > { %v258_v8 = vld [vmem:[%s886_s30 + $0x9] sm:$0xff] }
  0x22   : > { %224 = vrot.lane.b32.xlu1 %v209_v1, %s790_s4  ;;  %216 = vrot.lane.b32.xlu0 %v209_v1, %s791_s5  ;;  %v263_v9 = vsub.f32 %v259_v5, %v299_v6  ;;  %v260_v10 = vsub.f32 0.0, %v258_v8  ;;  %v319_v13 = vld [vmem:[%s886_s30 + $0x6] sm:$0xff]  ;;  %v339_v21 = vld [vmem:[%s886_s30 + $0x10] sm:$0xff]  ;;  %s944_s4 = scalar_lea.hbm %s1074_s2, %s932_s28 }
  0x23   : > { %v269_v15 = vld [vmem:[%s886_s30 + $0x5] sm:$0xff]  ;;  %v270_v18 = vld [vmem:[%s886_s30 + $0xd] sm:$0xff]  ;;  %s412_s30 = sshll.u32 %s199_s29, 4  ;;  %s946_s30 = int_to_ptr.vmem [resolvable:$true] %s412_s30 }
  0x24   : > { %v267_v11 = vadd.f32 %v263_v9, %v208_v0  ;;  %v264_v12 = vsub.f32 %v260_v10, %v300_v7 }
  0x26   : > { %232 = vrot.lane.b32.xlu1 %v209_v1, %s792_s6  ;;  %230 = vrot.lane.b32.xlu0 %v208_v0, %s792_s6  ;;  %v271_v16 = vadd.f32 %v269_v15, %v267_v11  ;;  %v268_v17 = vadd.f32 %v264_v12, %v209_v1 }
  0x28   : > { %v275_v19 = vadd.f32 %v319_v13, %v271_v16  ;;  %v272_v20 = vadd.f32 %v270_v18, %v268_v17 }
  0x2a   : > { %240 = vrot.lane.b32.xlu1 %v209_v1, %s793_s7  ;;  %238 = vrot.lane.b32.xlu0 %v208_v0, %s793_s7  ;;  %v276_v22 = vadd.f32 %v320_v14, %v272_v20  ;;  %s952_s7 = scalar_lea.hbm %s1075_s3, %s932_s28 }
  0x2e   : > { %291 = vrot.lane.b32.xlu0 %v895_v2, %s794_s8  ;;  %293 = vrot.lane.b32.xlu1 %v898_v3, %s794_s8 }
  0x32   : > { %303 = vrot.lane.b32.xlu0 %v299_v6, %s795_s9  ;;  %305 = vrot.lane.b32.xlu1 %v300_v7, %s795_s9 }
  0x36   : > { %311 = vrot.lane.b32.xlu0 %v299_v6, %s796_s10  ;;  %313 = vrot.lane.b32.xlu1 %v300_v7, %s796_s10 }
  0x3a   : > { %323 = vrot.lane.b32.xlu0 %v319_v13, %s795_s9  ;;  %325 = vrot.lane.b32.xlu1 %v320_v14, %s795_s9  ;;  %s650_s9 = scalar_lea.vmem %s936_s26, 256 }
  0x3b   : > { %p651_p12 = scmp.ne.s32.totalorder %s936_s26, %s650_s9 }
  0x3d   : > { %p652_p13 = pnand %p651_p12, %p864_p4 }
  0x3e   : > { %331 = vrot.lane.b32.xlu0 %v319_v13, %s796_s10  ;;  %333 = vrot.lane.b32.xlu1 %v320_v14, %s796_s10  ;;  %s797_s10 = smov [#allocation4]  }
  0x3f   : > { %p653_p0 = pneg %p652_p13 }
  0x42   : > { %343 = vrot.lane.b32.xlu0 %v339_v21, %s794_s8  ;;  %279 = vrot.lane.b32.xlu1 %v275_v19, %s792_s6  ;;  %s356_s8 = scalar_lea.sflag [#allocation5], %s929_s27 }
  0x46   : > { %281 = vrot.lane.b32.xlu0 %v276_v22, %s792_s6 }
  0x90   : > { %v223_v23 = vpop.permute.xlu1 %222  ;;  %v215_v24 = vpop.permute.xlu0 %214 }
  0x91   : > { %v220_v29 = vsub.f32 %v210_v25, %v215_v24 }
  0x93   : > { %v228_v34 = vadd.f32 %v223_v23, %v220_v29 }
  0x94   : > { %v225_v27 = vpop.permute.xlu1 %224  ;;  %v217_v28 = vpop.permute.xlu0 %216 }
  0x95   : > { %v221_v30 = vsub.f32 %v211_v26, %v217_v28 }
  0x97   : > { %v229_v31 = vadd.f32 %v225_v27, %v221_v30 }
  0x98   : > { %v233_v32 = vpop.permute.xlu1 %232  ;;  %v231_v33 = vpop.permute.xlu0 %230 }
  0x99   : > { %v237_v35 = vadd.f32 %v233_v32, %v229_v31  ;;  %v236_v36 = vadd.f32 %v231_v33, %v228_v34 }
  0x9c   : > { %v241_v37 = vpop.permute.xlu1 %240  ;;  %v239_v38 = vpop.permute.xlu0 %238 }
  0x9d   : > { %v245_v39 = vadd.f32 %v241_v37, %v237_v35  ;;  %v244_v40 = vadd.f32 %v239_v38, %v236_v36 }
  0x9f   : > { %250 = vrot.lane.b32.xlu0 %v245_v39, %s791_s5  ;;  %248 = vrot.lane.b32.xlu1 %v244_v40, %s791_s5 }
  0xa0   : > { %v292_v41 = vpop.permute.xlu0 %291  ;;  %v294_v42 = vpop.permute.xlu1 %293 }
  0xa1   : > { %v297_v43 = vsub.f32 %v895_v2, %v292_v41  ;;  %v298_v44 = vsub.f32 %v898_v3, %v294_v42 }
  0xa4   : > { %v304_v45 = vpop.permute.xlu0 %303  ;;  %v306_v46 = vpop.permute.xlu1 %305 }
  0xa5   : > { %v309_v47 = vadd.f32 %v304_v45, %v297_v43  ;;  %v310_v48 = vadd.f32 %v306_v46, %v298_v44 }
  0xa8   : > { %v312_v49 = vpop.permute.xlu0 %311  ;;  %v314_v50 = vpop.permute.xlu1 %313 }
  0xa9   : > { %v317_v51 = vsub.f32 %v309_v47, %v312_v49  ;;  %v318_v52 = vsub.f32 %v310_v48, %v314_v50 }
  0xac   : > { %v324_v53 = vpop.permute.xlu0 %323  ;;  %v326_v54 = vpop.permute.xlu1 %325 }
  0xad   : > { %v329_v55 = vsub.f32 %v317_v51, %v324_v53  ;;  %v330_v56 = vsub.f32 %v318_v52, %v326_v54 }
  0xb0   : > { %v332_v57 = vpop.permute.xlu0 %331  ;;  %v334_v58 = vpop.permute.xlu1 %333 }
  0xb1   : > { %v337_v59 = vadd.f32 %v332_v57, %v329_v55  ;;  %v338_v60 = vadd.f32 %v334_v58, %v330_v56 }
  0xb3   : > { %v340_v61 = vsub.f32 %v337_v59, %v898_v3  ;;  %v341_v62 = vsub.f32 %v338_v60, %v339_v21 }
  0xb4   : > { %v344_v63 = vpop.permute.xlu0 %343  ;;  %v280_v0 = vpop.permute.xlu1 %279 }
  0xb5   : > { %v346_v1 = vadd.f32 %v340_v61, %v294_v42  ;;  %v347_v2 = vadd.f32 %v344_v63, %v341_v62  ;;  %285 = vst.msk [vmem:[%s192_s23] sm:$0xff] %vm254_vm0, %v280_v0 }
  0xb7   : > { %348 = vst.msk [vmem:[%s199_s29] sm:$0xff] %vm254_vm0, %v346_v1  ;;  %349 = vst.msk [vmem:[%s199_s29 + $0x8] sm:$0xff] %vm254_vm0, %v347_v2  ;;  %s654_s29 = sshll.u32 %s797_s10, 4  ;;  %s655_s29 = int_to_ptr.vmem [resolvable:$false] %s654_s29 }
  0xb8   : > { %v282_v3 = vpop.permute.xlu0 %281  ;;  %s656_s15 = scalar_lea.vmem %s655_s29, 512  ;;  %p657_p1 = scmp.lt.s32.totalorder %s936_s26, %s655_s29 }
  0xb9   : > { %286 = vst.msk [vmem:[%s192_s23 + $0x8] sm:$0xff] %vm254_vm0, %v282_v3  ;;  %p658_p2 = scmp.lt.s32.totalorder %s656_s15, %s650_s9 }
  0xbb   : > { %p659_p3 = por %p658_p2, %p657_p1 }
  0xbd   : > { %p660_p5 = pnand %p659_p3, %p653_p0 }
  0xbf   : > { %663 = shalt.err (!%p660_p5)
}
  0xc0   : > { %s664_s23 = scalar_lea.hbm %s944_s4, 256  ;;  %s668_s6 = scalar_lea.hbm %s1074_s2, 512 }
  0xc1   : > { %p665_p6 = scmp.ne.s32.totalorder %s944_s4, %s664_s23  ;;  %p669_p10 = scmp.lt.u32.totalorder %s944_s4, %s1074_s2 }
  0xc2   : > { %p670_p11 = scmp.lt.u32.totalorder %s668_s6, %s664_s23  ;;  %p672_p13 = scmp.lt.u32.totalorder %s664_s23, %s944_s4 }
  0xc3   : > { %p666_p7 = pnand %p665_p6, %p864_p4 }
  0xc4   : > { %p671_p12 = por %p670_p11, %p669_p10 }
  0xc5   : > { %p667_p9 = pneg %p666_p7 }
  0xc6   : > { %p673_p0 = por %p672_p13, %p671_p12 }
  0xc8   : > { %p674_p1 = pnand %p673_p0, %p667_p9 }
  0xca   : > { %677 = shalt.err (!%p674_p1)
}
  0xcb   : > { %s798_s9 = smov 128   ;;  %s799_s15 = smov 8  }
  0xcc   : > { %577 = dma.vmem_to_hbm [thread:$0]  (%p864_p4), %s936_s26, 256, %s944_s4, %s356_s8, %s798_s9, %s798_s9, %s799_s15  }
  0xcd   : > { %s678_s23 = scalar_lea.vmem %s946_s30, 256  ;;  %s800_s18 = smov [#allocation6]  }
  0xce   : > { %p679_p2 = scmp.ne.s32.totalorder %s946_s30, %s678_s23  ;;  %s682_s5 = sshll.u32 %s800_s18, 4  ;;  %s683_s5 = int_to_ptr.vmem [resolvable:$false] %s682_s5 }
  0xcf   : > { %s684_s6 = scalar_lea.vmem %s683_s5, 512  ;;  %p685_p6 = scmp.lt.s32.totalorder %s946_s30, %s683_s5 }
  0xd0   : > { %p680_p3 = pnand %p679_p2, %p864_p4  ;;  %p686_p7 = scmp.lt.s32.totalorder %s684_s6, %s678_s23 }
  0xd2   : > { %p681_p5 = pneg %p680_p3  ;;  %p687_p9 = por %p686_p7, %p685_p6 }
  0xd4   : > { %p688_p10 = pnand %p687_p9, %p681_p5 }
  0xd6   : > { %691 = shalt.err (!%p688_p10)
}
  0xd7   : > { %s692_s26 = scalar_lea.hbm %s952_s7, 256  ;;  %s696_s29 = scalar_lea.hbm %s1075_s3, 512 }
  0xd8   : > { %p693_p11 = scmp.ne.s32.totalorder %s952_s7, %s692_s26  ;;  %p697_p0 = scmp.lt.u32.totalorder %s952_s7, %s1075_s3 }
  0xd9   : > { %p698_p1 = scmp.lt.u32.totalorder %s696_s29, %s692_s26  ;;  %p700_p3 = scmp.lt.u32.totalorder %s692_s26, %s952_s7 }
  0xda   : > { %p694_p12 = pnand %p693_p11, %p864_p4 }
  0xdb   : > { %p699_p2 = por %p698_p1, %p697_p0 }
  0xdc   : > { %p695_p13 = pneg %p694_p12 }
  0xdd   : > { %p701_p5 = por %p700_p3, %p699_p2 }
  0xdf   : > { %p702_p6 = pnand %p701_p5, %p695_p13 }
  0xe1   : > { %705 = shalt.err (!%p702_p6)
}
  0xe2   : > { %578 = dma.vmem_to_hbm [thread:$0]  (%p864_p4), %s946_s30, 256, %s952_s7, %s356_s8, %s798_s9, %s798_s9, %s799_s15  }
  0xe3   : > { %s185_s23 = scalar_lea.vmem [#allocation2], %s923_s21  ;;  %s1015_s10 = scalar_lea.hbm %s1073_s1, %s932_s28 }
  0xe4   : > { %s376_s6 = sshll.u32 %s185_s23, 4  ;;  %s1021_s27 = scalar_lea.sflag [#allocation3], %s183_s11  ;;  %s1009_s6 = int_to_ptr.vmem [resolvable:$true] %s376_s6 }
  0xe5   : > { %s706_s21 = scalar_lea.vmem %s1009_s6, 256  ;;  %s801_s30 = smov [#allocation2]  }
  0xe6   : > { %p707_p7 = scmp.ne.s32.totalorder %s1009_s6, %s706_s21  ;;  %s710_s7 = sshll.u32 %s801_s30, 4  ;;  %s711_s7 = int_to_ptr.vmem [resolvable:$false] %s710_s7 }
  0xe7   : > { %s712_s8 = scalar_lea.vmem %s711_s7, 512  ;;  %p713_p11 = scmp.lt.s32.totalorder %s1009_s6, %s711_s7 }
  0xe8   : > { %p708_p9 = pnand %p707_p7, %p864_p4  ;;  %p714_p12 = scmp.lt.s32.totalorder %s712_s8, %s706_s21 }
  0xea   : > { %p709_p10 = pneg %p708_p9  ;;  %p715_p13 = por %p714_p12, %p713_p11 }
  0xec   : > { %p716_p0 = pnand %p715_p13, %p709_p10 }
 0x111   : > { %v251_v4 = vpop.permute.xlu0 %250  ;;  %v249_v5 = vpop.permute.xlu1 %248 }
 0x112   : > { %256 = vst.msk [vmem:[%s185_s23 + $0x8] sm:$0xff] %vm254_vm0, %v251_v4  ;;  %255 = vst.msk [vmem:[%s185_s23] sm:$0xff] %vm254_vm0, %v249_v5 }
 0x113   : > { %719 = shalt.err (!%p716_p0)
}
 0x114   : > { %s720_s11 = scalar_lea.hbm %s1015_s10, 256  ;;  %s724_s18 = scalar_lea.hbm %s1073_s1, 512 }
 0x115   : > { %p721_p1 = scmp.ne.s32.totalorder %s1015_s10, %s720_s11  ;;  %p725_p5 = scmp.lt.u32.totalorder %s1015_s10, %s1073_s1 }
 0x116   : > { %p726_p6 = scmp.lt.u32.totalorder %s724_s18, %s720_s11  ;;  %p728_p9 = scmp.lt.u32.totalorder %s720_s11, %s1015_s10 }
 0x117   : > { %p722_p2 = pnand %p721_p1, %p864_p4 }
 0x118   : > { %p727_p7 = por %p726_p6, %p725_p5 }
 0x119   : > { %p723_p3 = pneg %p722_p2 }
 0x11a   : > { %p729_p10 = por %p728_p9, %p727_p7 }
 0x11c   : > { %p730_p11 = pnand %p729_p10, %p723_p3 }
 0x11e   : > { %733 = shalt.err (!%p730_p11)
}
 0x11f   : > { %576 = dma.vmem_to_hbm [thread:$0]  (%p864_p4), %s1009_s6, 256, %s1015_s10, %s1021_s27, %s798_s9, %s798_s9, %s799_s15  }
 0x120 PF: > { %p592_p12 = scmp.ge.s32.totalorder %s788_s17, 2  ;;  %s427_s26 = sand.u32 1, %s768_s12  }
 0x121   : > { %s428_s4 = scalar_lea.sflag [#allocation3], %s427_s26 }
 0x122   : > { %p583_p13 = pnand %p592_p12, %p873_p8 }
 0x124   : > { %759 = dma.done.wait (!%p583_p13), %s428_s4, 256  }
 0x125   : > { %761 = vsyncadd (!%p583_p13), %s428_s4, 4294967040  ;;  %s436_s22 = sand.u32 1, %s553_s19  }
 0x126   : > { %s437_s21 = scalar_lea.sflag [#allocation5], %s436_s22 }
 0x127   : > { %763 = dma.done.wait (!%p583_p13), %s437_s21, 512  }
 0x128   : > { %765 = vsyncadd (!%p583_p13), %s437_s21, 4294966784  ;;  %s20_s17 = sadd.s32 1, %s788_s17   ;;  %s1078_s12 = smov %s772_s13 }
 0x129   : > { %p17_p4 = scmp.ge.s32.totalorder %s20_s17, 4   ;;  %s1079_s13 = smov %s776_s14 }
 0x12a   : > { %s1080_s14 = smov %s879_s25  ;;  %s1081_s15 = smov %s784_s16 }
 0x12b   : > { %s1082_s16 = smov %s1084_s20  ;;  %19 = sbr.rel (!%p17_p4) target bundleno = 6 (0x6), region = 91 }
 0x132   :  { %451 = vsyncpa [#allocation3], 1 }
 0x133   :  { %453 = vsyncpa [#allocation3 + $0x1], 1 }
 0x134   :  { %454 = vsyncpa [#allocation5], 1 }
 0x135   :  { %456 = vsyncpa [#allocation5 + $0x1], 1 }

</bundles_post_ra>
